<compile_context>
chip_gen: v5e
topology: v5e:2x2
jax: 0.10.0
libtpu: 0.0.40
codegen_flags: <defaults>
</compile_context>

<pallas_src>
import functools

import jax
import jax.numpy as jnp
from jax.experimental import pallas as pl
from jax.experimental.pallas import tpu as pltpu

# ---- module constants (from DGG_LearnableK_Small.__init__ defaults) ----------
K_BIAS = 1.0
HS_START = 2.0
HS_END = -5.0
INTERVAL = HS_START - HS_END          # 7.0
LEAKY_SLOPE = 0.01                    # nn.LeakyReLU default (reference only)


# =============================================================================
# Fused, tiled kernel
# =============================================================================
def _dgg_tiled_kernel(x_ref, w_ref, b_ref, xs_ref, adj_ref, k_ref, shift_ref,
                      *, scale):
    """grid = (B/TB, N/TM, N/TN); axes (b, i, j), j innermost ("arbitrary")."""

    # k / shift are per-row-tile quantities: compute them once per (b, i) tile.
    @pl.when(pl.program_id(2) == 0)
    def _():
        x = x_ref[...]                                     # [TB, TM, Din]
        w = w_ref[...]                                     # [1,  Din]
        b_eff = b_ref[0]                                   # scalar (SMEM)
        # folded k_net: k = x @ w_eff^T + b_eff   (VPU multiply + XLU reduce;
        # no M=1 MXU matmul).  Same values drive both k output and adj.
        k = jnp.sum(x * w, axis=-1, keepdims=True) + b_eff  # [TB, TM, 1]
        k_ref[...] = k                                      # k output (j-invariant)
        shift_ref[...] = (k - 1.0) * INTERVAL               # persists across j

    xs = xs_ref[...][None]                                  # [1, 1, TN]
    z = xs + shift_ref[...]                                 # [TB, TM, TN]
    # sigmoid(z) as a single tanh EUP op; scale = 1/N (soft) or 1 (hard fwd).
    adj_ref[...] = (scale * (0.5 * (jnp.tanh(0.5 * z) + 1.0))).astype(adj_ref.dtype)


# =============================================================================
# Tile selection / VMEM budgeting
# =============================================================================
def _pick_tiles(B, N, Din):
    # Lane tile (TN): multiple of 128 when N allows (unmasked vst), else full N.
    tn = N
    for cand in (2048, 1024, 512, 256, 128):
        if N % cand == 0:
            tn = cand
            break
    # Sublane tile (TM): keep the f32 adj tile <= ~8 MiB so two pipeline
    # buffers fit comfortably inside v7x's 64 MiB VMEM (and trivially in
    # v5e/v6e's 128 MiB).
    max_tile_elems = 2 * 1024 * 1024            # 8 MiB of f32
    tm = N
    if N % 8 == 0 and N > 8:
        for cand in (2048, 1024, 512, 256, 128, 64, 32, 16, 8):
            if N % cand == 0 and cand * tn <= max_tile_elems:
                tm = cand
                break
    # Batch tile: one grid step for tiny graphs (amortize ~0.35us/step); one
    # batch element per step otherwise so the batch axis stays "parallel".
    tb = B if N < 128 else 1
    if B % tb:
        tb = 1
    return tb, tm, tn


def _vmem_limit_bytes(tb, tm, tn, din):
    f32 = 4
    adj_buf = tb * tm * tn * f32
    x_buf = tb * tm * din * f32
    k_buf = tb * tm * 128 * f32              # (TB, TM, 1) padded to 128 lanes
    xs_buf = 8 * max(tn, 128) * f32          # (1, TN) padded to 8 sublanes
    w_buf = 8 * max(din, 128) * f32
    scratch = tb * tm * 128 * f32
    need = 2 * (adj_buf + x_buf + k_buf + xs_buf + w_buf) + scratch
    return int(max(32 << 20, min(int(need * 1.3) + (2 << 20), 56 << 20)))


# =============================================================================
# Wrapper
# =============================================================================
@functools.partial(jax.jit, static_argnames=("hard", "adj_dtype", "tiles"))
def dgg_forward(x, temp, params, hard=False, adj_dtype=jnp.float32, tiles=None):
    # temp is accepted for API parity; softmax(0/temp) is uniform for any
    # temp > 0, so it has no effect on the collapsed forward.
    del temp
    x = x.astype(jnp.float32)
    B, N, Din = x.shape

    # Fold k_net's two Linears once (tiny tensors, outside the kernel):
    #   k = x @ (W_mu @ W_kp) + (b_mu @ W_kp + b_kp + k_bias)
    w_eff = (params["w_mu"] @ params["w_kp"]).reshape(1, Din).astype(jnp.float32)
    b_eff = ((params["b_mu"] @ params["w_kp"] + params["b_kp"]).reshape(1)
             + K_BIAS).astype(jnp.float32)

    # x_support as a 1-D lane row (computed once here, not as an N^2 iota
    # inside the kernel body).
    x_support = (HS_START - INTERVAL * jnp.arange(N, dtype=jnp.float32)).reshape(1, N)

    TB, TM, TN = _pick_tiles(B, N, Din) if tiles is None else tiles
    assert B % TB == 0 and N % TM == 0 and N % TN == 0
    grid = (B // TB, N // TM, N // TN)

    scale = 1.0 if hard else 1.0 / N
    kernel = functools.partial(_dgg_tiled_kernel, scale=scale)

    adj, k = pl.pallas_call(
        kernel,
        out_shape=(jax.ShapeDtypeStruct((B, N, N), adj_dtype),
                   jax.ShapeDtypeStruct((B, N, 1), jnp.float32)),
        grid=grid,
        in_specs=[
            pl.BlockSpec((TB, TM, Din), lambda b, i, j: (b, i, 0)),   # x (j-invariant)
            pl.BlockSpec((1, Din), lambda b, i, j: (0, 0)),           # folded weight
            pl.BlockSpec(memory_space=pltpu.MemorySpace.SMEM),        # folded bias
            pl.BlockSpec((1, TN), lambda b, i, j: (0, j)),            # x_support lane tile
        ],
        out_specs=[
            pl.BlockSpec((TB, TM, TN), lambda b, i, j: (b, i, j)),    # adj
            pl.BlockSpec((TB, TM, 1), lambda b, i, j: (b, i, 0)),     # k (j-invariant)
        ],
        scratch_shapes=[pltpu.VMEM((TB, TM, 1), jnp.float32)],        # (k-1)*interval
        compiler_params=pltpu.CompilerParams(
            dimension_semantics=("parallel", "parallel", "arbitrary"),
            vmem_limit_bytes=_vmem_limit_bytes(TB, TM, TN, Din)),
    )(x, w_eff, b_eff, x_support)

    return adj, k


# =============================================================================
# Deterministic parameter init (torch.nn.Linear-style uniform bounds)
# =============================================================================
def init_params(key, in_dim, latent_dim):
    L = latent_dim
    keys = jax.random.split(key, 8)

    def u(k, shape, fan_in):
        bound = 1.0 / (fan_in ** 0.5)
        return jax.random.uniform(k, shape, jnp.float32, -bound, bound)

    w_dist = u(keys[2], (2 * L,), 2 * L)   # distance Linear(2L, 1) weight
    return dict(
        w_in=u(keys[0], (in_dim, L), in_dim),
        b_in=u(keys[1], (1, L), in_dim),
        w_dl=w_dist[:L].reshape(L, 1),     # acts on x_proj[i] (first half of concat)
        w_dr=w_dist[L:].reshape(1, L),     # acts on x_proj[j] (second half of concat)
        b_d=u(keys[3], (1, 1), 2 * L),
        w_mu=u(keys[4], (in_dim, L), in_dim),
        b_mu=u(keys[5], (1, L), in_dim),
        w_kp=u(keys[6], (L, 1), L),
        b_kp=u(keys[7], (1, 1), L),
    )


# =============================================================================
# Pure-JAX reference: the FULL, un-collapsed forward (input_project softmax,
# pairwise distance MLP, N x N softmax, sort + scatter-back).  Verifies that
# the collapsed kernel is exactly equivalent (soft / hard=False branch).
# =============================================================================
def reference_forward(x, temp, params):
    B, N, _ = x.shape
    h = x @ params["w_in"] + params["b_in"]
    h = jnp.where(h >= 0, h, LEAKY_SLOPE * h)
    x_proj = jax.nn.softmax(h, axis=-1)

    left = x_proj @ params["w_dl"]                                   # [B, N, 1]
    right = jnp.einsum("bnl,l->bn", x_proj, params["w_dr"][0])       # [B, N]
    s = left + right[:, None, :] + params["b_d"][0, 0]
    s = jnp.where(s >= 0, s, LEAKY_SLOPE * s)
    prob = jnp.ones_like(s)                 # softmax over a size-1 out channel
    log_p = jnp.log(prob)
    edge_prob = jax.nn.softmax(log_p / temp, axis=-1)

    mu = x @ params["w_mu"] + params["b_mu"]
    k = mu @ params["w_kp"] + params["b_kp"] + K_BIAS

    idxs = jnp.argsort(-edge_prob, axis=-1)            # stable, as in torch.sort
    sorted_vals = jnp.take_along_axis(edge_prob, idxs, axis=-1)

    x_support = HS_START - INTERVAL * jnp.arange(N, dtype=jnp.float32)
    shift = (k - 1.0) * INTERVAL
    first_k = jax.nn.sigmoid(x_support[None, None, :] + shift)
    first_k_prob = sorted_vals * first_k

    inv = jnp.argsort(idxs, axis=-1)        # scatter == gather by inverse perm
    adj = jnp.take_along_axis(first_k_prob, inv, axis=-1)
    return adj, k


if __name__ == "__main__":
    B, N, IN_DIM, LATENT_DIM = 2, 8, 32, 64
    TEMP = 0.5

    key = jax.random.PRNGKey(0)
    kx, kp = jax.random.split(key)
    x = jax.random.normal(kx, (B, N, IN_DIM), jnp.float32)
    params = init_params(kp, IN_DIM, LATENT_DIM)

    # --- tiny module-default shape (single grid step) ------------------------
    adj, k = dgg_forward(x, TEMP, params)
    jax.block_until_ready((adj, k))
    adj_expect, k_expect = reference_forward(x, TEMP, params)
    assert adj.shape == (B, N, N) and k.shape == (B, N, 1)
    assert bool(jnp.all(jnp.isfinite(adj))) and bool(jnp.all(jnp.isfinite(k)))
    assert bool(jnp.allclose(adj, adj_expect, atol=1e-5, rtol=1e-5))
    assert bool(jnp.allclose(k, k_expect, atol=1e-4, rtol=1e-4))

    # --- larger graph exercising the tiled (b, i, j) grid, the j-invariant ---
    # x / k blocks and the pl.when-guarded shift scratch.
    N2 = 256
    x2 = jax.random.normal(jax.random.PRNGKey(1), (B, N2, IN_DIM), jnp.float32)
    adj2, k2 = dgg_forward(x2, TEMP, params, tiles=(1, 128, 128))
    jax.block_until_ready((adj2, k2))
    adj2_expect, k2_expect = reference_forward(x2, TEMP, params)
    assert adj2.shape == (B, N2, N2) and k2.shape == (B, N2, 1)
    assert bool(jnp.allclose(adj2, adj2_expect, atol=1e-5, rtol=1e-5))
    assert bool(jnp.allclose(k2, k2_expect, atol=1e-4, rtol=1e-4))

    print("KERNEL_OK")
</pallas_src>

<mosaic_0001>
module attributes {stable_mosaic.version = 11 : i64} {
  func.func @_dgg_tiled_kernel(%arg0: i32, %arg1: i32, %arg2: i32, %arg3: memref<2x8x32xf32, #tpu.memory_space<vmem>>, %arg4: memref<1x32xf32, #tpu.memory_space<vmem>>, %arg5: memref<1xf32, #tpu.memory_space<smem>>, %arg6: memref<1x8xf32, #tpu.memory_space<vmem>>, %arg7: memref<2x8x8xf32, #tpu.memory_space<vmem>>, %arg8: memref<2x8x1xf32, #tpu.memory_space<vmem>>, %arg9: memref<2x8x1xf32, #tpu.memory_space<vmem>>) attributes {dimension_semantics = [#tpu.dimension_semantics<parallel>, #tpu.dimension_semantics<parallel>, #tpu.dimension_semantics<arbitrary>], iteration_bounds = array<i64: 1, 1, 1>, scalar_prefetch = 0 : i64, scratch_operands = 1 : i64, tpu.core_type = #tpu.core_type<tc>, window_params = [{transform_indices = @transform_0, window_bounds = array<i64: 2, 8, 32>}, {pipeline_mode = #tpu.pipeline_mode<synchronous>, transform_indices = @transform_1, window_bounds = array<i64: 1, 32>}, {transform_indices = @transform_2, window_bounds = array<i64: 1>}, {transform_indices = @transform_3, window_bounds = array<i64: 1, 8>}, {transform_indices = @transform_4, window_bounds = array<i64: 2, 8, 8>}, {transform_indices = @transform_5, window_bounds = array<i64: 2, 8, 1>}]} {
    %c0_i32 = arith.constant 0 : i32
    %0 = arith.cmpi eq, %arg2, %c0_i32 : i32
    %1 = arith.extui %0 : i1 to i32
    %c0_i32_0 = arith.constant 0 : i32
    %2 = arith.cmpi ne, %1, %c0_i32_0 : i32
    scf.if %2 {
      %c0_11 = arith.constant 0 : index
      %c0_12 = arith.constant 0 : index
      %c0_13 = arith.constant 0 : index
      %19 = vector.load %arg3[%c0_11, %c0_12, %c0_13] : memref<2x8x32xf32, #tpu.memory_space<vmem>>, vector<2x8x32xf32>
      %c0_14 = arith.constant 0 : index
      %c0_15 = arith.constant 0 : index
      %20 = vector.load %arg4[%c0_14, %c0_15] : memref<1x32xf32, #tpu.memory_space<vmem>>, vector<1x32xf32>
      %c0_16 = arith.constant 0 : index
      %21 = memref.load %arg5[%c0_16] : memref<1xf32, #tpu.memory_space<smem>>
      %22 = vector.shape_cast %20 : vector<1x32xf32> to vector<1x1x32xf32>
      %23 = vector.broadcast %22 : vector<1x1x32xf32> to vector<2x8x32xf32>
      %24 = arith.mulf %19, %23 : vector<2x8x32xf32>
      %cst_17 = arith.constant dense<0.000000e+00> : vector<2x8xf32>
      %25 = vector.multi_reduction <add>, %24, %cst_17 [2] : vector<2x8x32xf32> to vector<2x8xf32>
      %26 = vector.shape_cast %25 : vector<2x8xf32> to vector<2x8x1xf32>
      %27 = vector.broadcast %21 : f32 to vector<2x8x1xf32>
      %28 = arith.addf %26, %27 : vector<2x8x1xf32>
      %c0_18 = arith.constant 0 : index
      %c0_19 = arith.constant 0 : index
      %c0_20 = arith.constant 0 : index
      %29 = vector.load %arg8[%c0_18, %c0_19, %c0_20] : memref<2x8x1xf32, #tpu.memory_space<vmem>>, vector<2x8x1xf32>
      tpu.vector_store %arg8[%c0_18, %c0_19, %c0_20], %28 {strides = array<i32>} : memref<2x8x1xf32, #tpu.memory_space<vmem>>, vector<2x8x1xf32>,
      %cst_21 = arith.constant 1.000000e+00 : f32
      %30 = vector.broadcast %cst_21 : f32 to vector<2x8x1xf32>
      %31 = arith.subf %28, %30 : vector<2x8x1xf32>
      %cst_22 = arith.constant 7.000000e+00 : f32
      %32 = vector.broadcast %cst_22 : f32 to vector<2x8x1xf32>
      %33 = arith.mulf %31, %32 : vector<2x8x1xf32>
      %c0_23 = arith.constant 0 : index
      %c0_24 = arith.constant 0 : index
      %c0_25 = arith.constant 0 : index
      %34 = vector.load %arg9[%c0_23, %c0_24, %c0_25] : memref<2x8x1xf32, #tpu.memory_space<vmem>>, vector<2x8x1xf32>
      tpu.vector_store %arg9[%c0_23, %c0_24, %c0_25], %33 {strides = array<i32>} : memref<2x8x1xf32, #tpu.memory_space<vmem>>, vector<2x8x1xf32>,
    } else {
    }
    %c0 = arith.constant 0 : index
    %c0_1 = arith.constant 0 : index
    %3 = vector.load %arg6[%c0, %c0_1] : memref<1x8xf32, #tpu.memory_space<vmem>>, vector<1x8xf32>
    %4 = vector.shape_cast %3 : vector<1x8xf32> to vector<1x1x8xf32>
    %c0_2 = arith.constant 0 : index
    %c0_3 = arith.constant 0 : index
    %c0_4 = arith.constant 0 : index
    %5 = vector.load %arg9[%c0_2, %c0_3, %c0_4] : memref<2x8x1xf32, #tpu.memory_space<vmem>>, vector<2x8x1xf32>
    %6 = vector.broadcast %4 : vector<1x1x8xf32> to vector<2x8x8xf32>
    %7 = vector.broadcast %5 : vector<2x8x1xf32> to vector<2x8x8xf32>
    %8 = arith.addf %6, %7 : vector<2x8x8xf32>
    %cst = arith.constant 5.000000e-01 : f32
    %9 = vector.broadcast %cst : f32 to vector<2x8x8xf32>
    %10 = arith.mulf %9, %8 : vector<2x8x8xf32>
    %11 = math.tanh %10 : vector<2x8x8xf32>
    %cst_5 = arith.constant 1.000000e+00 : f32
    %12 = vector.broadcast %cst_5 : f32 to vector<2x8x8xf32>
    %13 = arith.addf %11, %12 : vector<2x8x8xf32>
    %cst_6 = arith.constant 5.000000e-01 : f32
    %14 = vector.broadcast %cst_6 : f32 to vector<2x8x8xf32>
    %15 = arith.mulf %14, %13 : vector<2x8x8xf32>
    %cst_7 = arith.constant 1.250000e-01 : f32
    %16 = vector.broadcast %cst_7 : f32 to vector<2x8x8xf32>
    %17 = arith.mulf %16, %15 : vector<2x8x8xf32>
    %c0_8 = arith.constant 0 : index
    %c0_9 = arith.constant 0 : index
    %c0_10 = arith.constant 0 : index
    %18 = vector.load %arg7[%c0_8, %c0_9, %c0_10] : memref<2x8x8xf32, #tpu.memory_space<vmem>>, vector<2x8x8xf32>
    tpu.vector_store %arg7[%c0_8, %c0_9, %c0_10], %17 {strides = array<i32>} : memref<2x8x8xf32, #tpu.memory_space<vmem>>, vector<2x8x8xf32>,
    return
  }
  func.func @transform_0(%arg0: i32, %arg1: i32, %arg2: i32) -> (i32, i32, i32) {
    %c0_i32 = arith.constant 0 : i32
    %c0_i32_0 = arith.constant 0 : i32
    return %arg0, %arg1, %c0_i32 : i32, i32, i32
  }
  func.func @transform_1(%arg0: i32, %arg1: i32, %arg2: i32) -> (i32, i32) {
    %c0_i32 = arith.constant 0 : i32
    %c0_i32_0 = arith.constant 0 : i32
    %c0_i32_1 = arith.constant 0 : i32
    return %c0_i32, %c0_i32_0 : i32, i32
  }
  func.func @transform_2(%arg0: i32, %arg1: i32, %arg2: i32) -> i32 {
    %c0_i32 = arith.constant 0 : i32
    %c0_i32_0 = arith.constant 0 : i32
    return %c0_i32 : i32
  }
  func.func @transform_3(%arg0: i32, %arg1: i32, %arg2: i32) -> (i32, i32) {
    %c0_i32 = arith.constant 0 : i32
    %c0_i32_0 = arith.constant 0 : i32
    return %c0_i32, %arg2 : i32, i32
  }
  func.func @transform_4(%arg0: i32, %arg1: i32, %arg2: i32) -> (i32, i32, i32) {
    %c0_i32 = arith.constant 0 : i32
    return %arg0, %arg1, %arg2 : i32, i32, i32
  }
  func.func @transform_5(%arg0: i32, %arg1: i32, %arg2: i32) -> (i32, i32, i32) {
    %c0_i32 = arith.constant 0 : i32
    %c0_i32_0 = arith.constant 0 : i32
    return %arg0, %arg1, %c0_i32 : i32, i32, i32
  }
}

</mosaic_0001>

<bundles_post_ra>
// kernel: dgg_forward.1
= control target key start
LH: loop header
LB: loop body
LE: loop exit
PB: predicated region body
PF: predicated region fallthrough
CT: control target
= control target key end

     0   :  { %vm34_vm0 = vcmask 261120   ;;  %s204_s0 = inlined_call_operand.vmem [shape: f32[2,8,32], index: 0, kind: input, shape index: {}]   ;;  %s205_s1 = inlined_call_operand.vmem [shape: f32[1,32], index: 1, kind: input, shape index: {}]   ;;  %s206_s2 = inlined_call_operand.<no memory space> [shape: f32[1], index: 2, kind: input, shape index: {}]   ;;  %s207_s3 = inlined_call_operand.vmem [shape: f32[1,8], index: 3, kind: input, shape index: {}]   ;;  %s208_s4 = inlined_call_operand.hbm [shape: f32[2,8,8], index: 4, kind: output, shape index: {0}]   ;;  %s209_s5 = inlined_call_operand.vmem [shape: f32[2,8,1], index: 5, kind: output, shape index: {1}]  }
   0x1   :  { %v25_v0 = vld [vmem:[%s204_s0] sm:$0xff] }
   0x2   :  { %v114_v1 = vld [vmem:[%s205_s1] ss:$0 sm:$0xff] }
   0x3   :  { %12 = vsyncpa [#allocation5], 0  ;;  %v32_v2 = vmul.f32 %v114_v1, %v25_v0  ;;  %v26_v3 = vld [vmem:[%s204_s0 + $0x8] sm:$0xff]  ;;  %v146_v7 = vmov 0   ;;  %v41_v8 = vstv %s206_s2  ;;  %vm44_vm1 = vcmask 7168   ;;  %s90_s6 = sshll.u32 %s208_s4, 4  ;;  %s91_s6 = int_to_ptr.hbm [resolvable:$true] %s90_s6 }
   0x4   :  { %v33_v5 = vmul.f32 %v114_v1, %v26_v3  ;;  %112 = vset.pattern.permute.xlu1 %v146_v7  ;;  %113 = vset.pattern.permute.xlu0 %v146_v7  ;;  %v115_v19 = vld [vmem:[%s207_s3] ss:$0 sm:$0xff]  ;;  %vm81_vm2 = vcmask 64512   ;;  %s148_s7 = smov 128   ;;  %s149_s8 = smov 8  }
   0x5   :  { %v35_v4 = vsel %vm34_vm0, %v32_v2, 0.0 }
   0x6   :  { %36 = vadd.xlane.f32.xlu0 %v35_v4  ;;  %v38_v6 = vsel %vm34_vm0, %v33_v5, 0.0 }
   0xe   :  { %39 = vadd.xlane.f32.xlu0 %v38_v6 }
  0x79   :  { %v37_v9 = vpop.xlane.xlu0 %36 }
  0x7a   :  { %v42_v10 = vadd.f32 %v41_v8, %v37_v9 }
  0x7c   :  { %45 = vst.msk [vmem:[%s209_s5] sm:$0xff] %vm44_vm1, %v42_v10  ;;  %v106_v11 = vadd.f32 -1.0, %v42_v10 }
  0x7e   :  { %v49_v12 = vmul.f32 7.0, %v106_v11 }
  0x80   :  { %51 = vst.msk [vmem:[#allocation2] sm:$0xff] %vm44_vm1, %v49_v12 }
  0x81   :  { %v40_v13 = vpop.xlane.xlu0 %39 }
  0x82   :  { %v43_v14 = vadd.f32 %v41_v8, %v40_v13 }
  0x84   :  { %46 = vst.msk [vmem:[%s209_s5 + $0x8] sm:$0xff] %vm44_vm1, %v43_v14  ;;  %v107_v15 = vadd.f32 -1.0, %v43_v14  ;;  %s147_s5 = smov [#allocation4]  }
  0x85   :  { %s88_s29 = sshll.u32 %s147_s5, 4  ;;  %s89_s29 = int_to_ptr.vmem [resolvable:$true] %s88_s29 }
  0x86   :  { %v50_v16 = vmul.f32 7.0, %v107_v15 }
  0x87   :  { %v54_v17 = vld [vmem:[#allocation2] sm:$0xff] }
  0x88   :  { %52 = vst.msk [vmem:[#allocation2 + $0x8] sm:$0xff] %vm44_vm1, %v50_v16  ;;  %61 = vperm.xlu1 %112, %v54_v17  }
  0x8f   :  { %v55_v18 = vld [vmem:[#allocation2 + $0x8] sm:$0xff] }
  0x90   :  { %66 = vperm.xlu1 %112, %v55_v18  }
  0xfa   :  { %v62_v20 = vpop.permute.xlu1 %61 }
  0xfb   :  { %v69_v21 = vadd.f32 %v115_v19, %v62_v20 }
  0xfd   :  { %v71_v22 = vmul.f32 0.5, %v69_v21 }
  0xff   :  { %116 = vtanh.f32 %v71_v22 }
 0x102   :  { %v67_v23 = vpop.permute.xlu1 %66 }
 0x103   :  { %v70_v24 = vadd.f32 %v115_v19, %v67_v23 }
 0x105   :  { %v117_v25 = vpop.eup %116  ;;  %v72_v26 = vmul.f32 0.5, %v70_v24 }
 0x106   :  { %v75_v27 = vadd.f32 1.0, %v117_v25 }
 0x107   :  { %118 = vtanh.f32 %v72_v26 }
 0x108   :  { %v77_v28 = vmul.f32 0.5, %v75_v27 }
 0x10a   :  { %v79_v29 = vmul.f32 0.125, %v77_v28 }
 0x10c   :  { %82 = vst.msk [vmem:[#allocation4] sm:$0xff] %vm81_vm2, %v79_v29 }
 0x10d   :  { %v119_v30 = vpop.eup %118 }
 0x10e   :  { %v76_v31 = vadd.f32 1.0, %v119_v30 }
 0x110   :  { %v78_v32 = vmul.f32 0.5, %v76_v31 }
 0x112   :  { %v80_v33 = vmul.f32 0.125, %v78_v32 }
 0x114   :  { %83 = vst.msk [vmem:[#allocation4 + $0x8] sm:$0xff] %vm81_vm2, %v80_v33 }
 0x115   :  { %96 = dma.vmem_to_hbm [thread:$0]  %s89_s29, 256, %s91_s6, [#allocation5], %s148_s7, %s148_s7, %s149_s8  }
 0x116   :  { %144 = dma.done.wait [#allocation5], 256  }
 0x117   :  { %145 = vsyncadd [#allocation5], 4294967040 }
 0x118   :  { %105 = vsyncpa [#allocation5], 1 }

</bundles_post_ra>
